<compile_context>
chip_gen: v5e
topology: v5e:2x2
jax: 0.10.0
libtpu: 0.0.40
codegen_flags: <defaults>
</compile_context>

<pallas_src>
import functools

import jax
import jax.numpy as jnp
from jax.experimental import pallas as pl
from jax.experimental.pallas import tpu as pltpu


def _round_up(n: int, m: int) -> int:
    return ((n + m - 1) // m) * m


@functools.lru_cache(maxsize=None)
def _vmem_cap_bytes() -> int:
    """Usable VMEM budget for this chip generation (~75% of physical)."""
    try:
        cap = int(pltpu.get_tpu_info().vmem_capacity_bytes)
    except Exception:  # detection unavailable -> assume smallest (v7x per-TC)
        cap = 64 << 20
    return max(32 << 20, min(cap * 3 // 4, 100 << 20))


def mlp_kernel(x_ref, w1_ref, b1_ref, w2_ref, b2_ref, o_ref):
    # x_ref : (TB, F)   w1_ref: (F, H)    b1_ref: (1, H)   [biases in f32]
    # w2_ref: (H, Op)   b2_ref: (1, Op)   o_ref : (TB, Op)
    # Cast x to the MXU compute dtype in-kernel (cheaper than a wrapper-side
    # cast pass: 4 B/elem of HBM traffic here vs 4+2+2 B/elem via the wrapper).
    x = x_ref[...].astype(w1_ref.dtype)
    # Layer 1: MXU matmul with f32 accumulation; bias + ReLU in f32 on the VPU.
    h = jnp.dot(x, w1_ref[...], preferred_element_type=jnp.float32)
    h = jnp.maximum(h + b1_ref[...], 0.0)
    # Layer 2: cast activations back to the weight compute dtype for the MXU.
    y = jnp.dot(h.astype(w2_ref.dtype), w2_ref[...],
                preferred_element_type=jnp.float32)
    o_ref[...] = (y + b2_ref[...]).astype(o_ref.dtype)


def prepare_params(w1, b1, w2, b2, *, compute_dtype=jnp.bfloat16):
    """Cast / pad the weights ONCE; callers cache the result across forwards.

    Only the output-feature axis is lane-padded, and only when O >= 64; F and
    H are consumed as full-dim blocks so tiny feature dims cost no extra DMA.
    """
    F, H = w1.shape
    H2, O = w2.shape
    assert H2 == H, "w1/w2 hidden dims disagree"
    Op = O if O < 64 else _round_up(O, 128)
    w1c = jnp.asarray(w1).astype(compute_dtype)
    b1c = jnp.asarray(b1).reshape(1, H).astype(jnp.float32)
    w2c = jnp.pad(jnp.asarray(w2), ((0, 0), (0, Op - O))).astype(compute_dtype)
    b2c = jnp.pad(jnp.asarray(b2).reshape(1, O),
                  ((0, 0), (0, Op - O))).astype(jnp.float32)
    return w1c, b1c, w2c, b2c


@functools.partial(
    jax.jit, static_argnames=("out_features", "tb", "single_buffer_weights"))
def net_forward(x, w1c, b1c, w2c, b2c, *, out_features, tb=512,
                single_buffer_weights=True):
    B, F = x.shape
    F2, H = w1c.shape
    H2, Op = w2c.shape
    assert F2 == F and H2 == H, "param shapes inconsistent with x"
    O = out_features
    out_dtype = x.dtype

    # Balanced batch tiles: <= tb rows each, a multiple of 8, at least two
    # grid steps once B > 8 (v7x megacore + DMA/compute overlap), and a masked
    # tail block instead of padding the batch axis.
    max_tb = max(8, (tb // 8) * 8)
    num_tiles = pl.cdiv(B, max_tb)
    if B > 8:
        num_tiles = max(num_tiles, 2)
    TB = _round_up(pl.cdiv(B, num_tiles), 8)
    grid = (pl.cdiv(B, TB),)

    cbytes = jnp.dtype(w1c.dtype).itemsize
    xbytes = jnp.dtype(x.dtype).itemsize
    obytes = jnp.dtype(out_dtype).itemsize
    wbuf = 1 if single_buffer_weights else 2

    vmem_estimate = (
        2 * TB * F * xbytes                    # x tiles (double-buffered)
        + 2 * TB * Op * obytes                 # out tiles (double-buffered)
        + wbuf * (F * H + H * Op) * cbytes     # resident weights
        + wbuf * (H + Op) * 4                  # resident biases (f32)
        + TB * F * cbytes                      # in-kernel cast copy of x
        + TB * H * (4 + cbytes)                # f32 h + compute-dtype copy
        + TB * Op * 4                          # f32 y
    )
    vmem_limit = int(min(max(2 * vmem_estimate, 32 << 20), _vmem_cap_bytes()))

    cost = pl.CostEstimate(
        flops=2 * B * (F * H + H * Op),
        transcendentals=0,
        bytes_accessed=(x.size * xbytes + w1c.size * cbytes + w2c.size * cbytes
                        + b1c.size * 4 + b2c.size * 4 + B * Op * obytes),
    )

    # Weights/biases never change across grid steps; single-buffer them so
    # they are DMA'd once and occupy 1x (not 2x) VMEM.
    wmode = {"pipeline_mode": pl.Buffered(1)} if single_buffer_weights else {}

    out = pl.pallas_call(
        mlp_kernel,
        out_shape=jax.ShapeDtypeStruct((B, Op), out_dtype),
        grid_spec=pl.GridSpec(
            grid=grid,
            in_specs=[
                pl.BlockSpec((TB, F), lambda i: (i, 0)),           # x: batch-tiled
                pl.BlockSpec((F, H), lambda i: (0, 0), **wmode),   # w1: resident
                pl.BlockSpec((1, H), lambda i: (0, 0), **wmode),   # b1: resident
                pl.BlockSpec((H, Op), lambda i: (0, 0), **wmode),  # w2: resident
                pl.BlockSpec((1, Op), lambda i: (0, 0), **wmode),  # b2: resident
            ],
            out_specs=pl.BlockSpec((TB, Op), lambda i: (i, 0)),
        ),
        compiler_params=pltpu.CompilerParams(
            dimension_semantics=("parallel",),   # batch tiles are independent
            vmem_limit_bytes=vmem_limit,
        ),
        cost_estimate=cost,
    )(x, w1c, b1c, w2c, b2c)

    return out if Op == O else out[:, :O]


def init_linear(key, fan_in, fan_out, dtype=jnp.float32):
    # Deterministic init mimicking torch.nn.Linear (uniform +-1/sqrt(fan_in)).
    kw, kb = jax.random.split(key)
    bound = 1.0 / (fan_in ** 0.5)
    # Stored as (in, out) so the kernel computes x @ W.
    w = jax.random.uniform(kw, (fan_in, fan_out), dtype, -bound, bound)
    b = jax.random.uniform(kb, (fan_out,), dtype, -bound, bound)
    return w, b


if __name__ == "__main__":
    # NOTE: at the literal ApproNN sizes (B=8, F=4, H=32, O=4) the pallas_call
    # fixed overhead dominates any tiling choice; the kernel pays off once B
    # and/or H reach the hundreds-to-thousands.  Shapes are kept small here
    # for a fast deterministic check; the second config exercises the
    # multi-tile grid and the masked tail block.
    def ref_forward(x, w1, b1, w2, b2):
        return jnp.maximum(x @ w1 + b1, 0.0) @ w2 + b2

    def run_case(case_key, B, F, H, O, *, single_buffer):
        kx, k1, k2 = jax.random.split(case_key, 3)
        x = jax.random.normal(kx, (B, F), dtype=jnp.float32)
        w1, b1 = init_linear(k1, F, H)
        w2, b2 = init_linear(k2, H, O)
        ref = ref_forward(x, w1, b1, w2, b2)

        # Production path: bf16 MXU inputs, f32 accumulation.
        p_bf16 = prepare_params(w1, b1, w2, b2, compute_dtype=jnp.bfloat16)
        out_bf16 = jax.block_until_ready(
            net_forward(x, *p_bf16, out_features=O,
                        single_buffer_weights=single_buffer))
        # Validation-only path: full f32 compute for a tight correctness check.
        p_f32 = prepare_params(w1, b1, w2, b2, compute_dtype=jnp.float32)
        out_f32 = jax.block_until_ready(
            net_forward(x, *p_f32, out_features=O,
                        single_buffer_weights=single_buffer))

        assert out_bf16.shape == (B, O) and out_f32.shape == (B, O)
        assert jnp.allclose(out_f32, ref, atol=1e-4, rtol=1e-4)
        assert jnp.allclose(out_bf16, ref, atol=5e-2, rtol=5e-2)

    key = jax.random.PRNGKey(0)
    k_a, k_b = jax.random.split(key)
    cases = [
        (k_a, 8, 4, 32, 4),     # literal Net(n_features=4, n_hidden=32, n_output=4)
        (k_b, 300, 16, 64, 4),  # multi-tile grid + non-divisible masked tail
    ]
    try:
        for c in cases:
            run_case(*c, single_buffer=True)
    except Exception:
        # Compatibility fallback: jax builds without Buffered(1) single-buffer
        # support fall back to default double-buffered resident weights.
        for c in cases:
            run_case(*c, single_buffer=False)

    print("KERNEL_OK")
</pallas_src>

<mosaic_0001>
module attributes {stable_mosaic.version = 11 : i64} {
  func.func @mlp_kernel(%arg0: i32, %arg1: memref<8x4xf32, #tpu.memory_space<vmem>>, %arg2: memref<4x32xbf16, #tpu.memory_space<vmem>>, %arg3: memref<1x32xf32, #tpu.memory_space<vmem>>, %arg4: memref<32x4xbf16, #tpu.memory_space<vmem>>, %arg5: memref<1x4xf32, #tpu.memory_space<vmem>>, %arg6: memref<8x4xf32, #tpu.memory_space<vmem>>) attributes {dimension_semantics = [#tpu.dimension_semantics<parallel>], iteration_bounds = array<i64: 1>, scalar_prefetch = 0 : i64, scratch_operands = 0 : i64, tpu.core_type = #tpu.core_type<tc>, window_params = [{transform_indices = @transform_0, window_bounds = array<i64: 8, 4>}, {pipeline_mode = #tpu.pipeline_mode<synchronous>, transform_indices = @transform_1, window_bounds = array<i64: 4, 32>}, {pipeline_mode = #tpu.pipeline_mode<synchronous>, transform_indices = @transform_2, window_bounds = array<i64: 1, 32>}, {pipeline_mode = #tpu.pipeline_mode<synchronous>, transform_indices = @transform_3, window_bounds = array<i64: 32, 4>}, {pipeline_mode = #tpu.pipeline_mode<synchronous>, transform_indices = @transform_4, window_bounds = array<i64: 1, 4>}, {transform_indices = @transform_5, window_bounds = array<i64: 8, 4>}]} {
    %c0 = arith.constant 0 : index
    %c0_0 = arith.constant 0 : index
    %0 = vector.load %arg1[%c0, %c0_0] : memref<8x4xf32, #tpu.memory_space<vmem>>, vector<8x4xf32>
    %1 = arith.truncf %0 : vector<8x4xf32> to vector<8x4xbf16>
    %c0_1 = arith.constant 0 : index
    %c0_2 = arith.constant 0 : index
    %2 = vector.load %arg2[%c0_1, %c0_2] : memref<4x32xbf16, #tpu.memory_space<vmem>>, vector<4x32xbf16>
    %cst = arith.constant dense<0.000000e+00> : vector<8x32xf32>
    %3 = tpu.matmul %1, %2, %cst {dimension_numbers = #tpu.dot_dimension_numbers<[1], [0], [0], [1], [0, 0, 1, 1], [], []>} : vector<8x4xbf16>, vector<4x32xbf16>, vector<8x32xf32> -> vector<8x32xf32>
    %c0_3 = arith.constant 0 : index
    %c0_4 = arith.constant 0 : index
    %4 = vector.load %arg3[%c0_3, %c0_4] : memref<1x32xf32, #tpu.memory_space<vmem>>, vector<1x32xf32>
    %5 = vector.broadcast %4 : vector<1x32xf32> to vector<8x32xf32>
    %6 = arith.addf %3, %5 : vector<8x32xf32>
    %cst_5 = arith.constant 0.000000e+00 : f32
    %7 = vector.broadcast %cst_5 : f32 to vector<8x32xf32>
    %8 = arith.maximumf %6, %7 : vector<8x32xf32>
    %9 = arith.truncf %8 : vector<8x32xf32> to vector<8x32xbf16>
    %c0_6 = arith.constant 0 : index
    %c0_7 = arith.constant 0 : index
    %10 = vector.load %arg4[%c0_6, %c0_7] : memref<32x4xbf16, #tpu.memory_space<vmem>>, vector<32x4xbf16>
    %cst_8 = arith.constant dense<0.000000e+00> : vector<8x4xf32>
    %11 = tpu.matmul %9, %10, %cst_8 {dimension_numbers = #tpu.dot_dimension_numbers<[1], [0], [0], [1], [0, 0, 1, 1], [], []>} : vector<8x32xbf16>, vector<32x4xbf16>, vector<8x4xf32> -> vector<8x4xf32>
    %c0_9 = arith.constant 0 : index
    %c0_10 = arith.constant 0 : index
    %12 = vector.load %arg5[%c0_9, %c0_10] : memref<1x4xf32, #tpu.memory_space<vmem>>, vector<1x4xf32>
    %13 = vector.broadcast %12 : vector<1x4xf32> to vector<8x4xf32>
    %14 = arith.addf %11, %13 : vector<8x4xf32>
    %c0_11 = arith.constant 0 : index
    %c0_12 = arith.constant 0 : index
    %15 = vector.load %arg6[%c0_11, %c0_12] : memref<8x4xf32, #tpu.memory_space<vmem>>, vector<8x4xf32>
    tpu.vector_store %arg6[%c0_11, %c0_12], %14 {strides = array<i32>} : memref<8x4xf32, #tpu.memory_space<vmem>>, vector<8x4xf32>,
    return
  }
  func.func @transform_0(%arg0: i32) -> (i32, i32) {
    %c0_i32 = arith.constant 0 : i32
    %c0_i32_0 = arith.constant 0 : i32
    return %arg0, %c0_i32 : i32, i32
  }
  func.func @transform_1(%arg0: i32) -> (i32, i32) {
    %c0_i32 = arith.constant 0 : i32
    %c0_i32_0 = arith.constant 0 : i32
    %c0_i32_1 = arith.constant 0 : i32
    return %c0_i32, %c0_i32_0 : i32, i32
  }
  func.func @transform_2(%arg0: i32) -> (i32, i32) {
    %c0_i32 = arith.constant 0 : i32
    %c0_i32_0 = arith.constant 0 : i32
    %c0_i32_1 = arith.constant 0 : i32
    return %c0_i32, %c0_i32_0 : i32, i32
  }
  func.func @transform_3(%arg0: i32) -> (i32, i32) {
    %c0_i32 = arith.constant 0 : i32
    %c0_i32_0 = arith.constant 0 : i32
    %c0_i32_1 = arith.constant 0 : i32
    return %c0_i32, %c0_i32_0 : i32, i32
  }
  func.func @transform_4(%arg0: i32) -> (i32, i32) {
    %c0_i32 = arith.constant 0 : i32
    %c0_i32_0 = arith.constant 0 : i32
    %c0_i32_1 = arith.constant 0 : i32
    return %c0_i32, %c0_i32_0 : i32, i32
  }
  func.func @transform_5(%arg0: i32) -> (i32, i32) {
    %c0_i32 = arith.constant 0 : i32
    %c0_i32_0 = arith.constant 0 : i32
    return %arg0, %c0_i32 : i32, i32
  }
}

module attributes {stable_mosaic.version = 11 : i64} {
  func.func @mlp_kernel(%arg0: i32, %arg1: memref<8x4xf32, #tpu.memory_space<vmem>>, %arg2: memref<4x32xbf16, #tpu.memory_space<vmem>>, %arg3: memref<1x32xf32, #tpu.memory_space<vmem>>, %arg4: memref<32x4xbf16, #tpu.memory_space<vmem>>, %arg5: memref<1x4xf32, #tpu.memory_space<vmem>>, %arg6: memref<8x4xf32, #tpu.memory_space<vmem>>) attributes {dimension_semantics = [#tpu.dimension_semantics<parallel>], iteration_bounds = array<i64: 1>, scalar_prefetch = 0 : i64, scratch_operands = 0 : i64, tpu.core_type = #tpu.core_type<tc>, window_params = [{transform_indices = @transform_0, window_bounds = array<i64: 8, 4>}, {pipeline_mode = #tpu.pipeline_mode<synchronous>, transform_indices = @transform_1, window_bounds = array<i64: 4, 32>}, {pipeline_mode = #tpu.pipeline_mode<synchronous>, transform_indices = @transform_2, window_bounds = array<i64: 1, 32>}, {pipeline_mode = #tpu.pipeline_mode<synchronous>, transform_indices = @transform_3, window_bounds = array<i64: 32, 4>}, {pipeline_mode = #tpu.pipeline_mode<synchronous>, transform_indices = @transform_4, window_bounds = array<i64: 1, 4>}, {transform_indices = @transform_5, window_bounds = array<i64: 8, 4>}]} {
    %c0 = arith.constant 0 : index
    %c0_0 = arith.constant 0 : index
    %0 = vector.load %arg1[%c0, %c0_0] : memref<8x4xf32, #tpu.memory_space<vmem>>, vector<8x4xf32>
    %1 = arith.truncf %0 : vector<8x4xf32> to vector<8x4xbf16>
    %c0_1 = arith.constant 0 : index
    %c0_2 = arith.constant 0 : index
    %2 = vector.load %arg2[%c0_1, %c0_2] : memref<4x32xbf16, #tpu.memory_space<vmem>>, vector<4x32xbf16>
    %cst = arith.constant dense<0.000000e+00> : vector<8x32xf32>
    %3 = tpu.matmul %1, %2, %cst {dimension_numbers = #tpu.dot_dimension_numbers<[1], [0], [0], [1], [0, 0, 1, 1], [], []>} : vector<8x4xbf16>, vector<4x32xbf16>, vector<8x32xf32> -> vector<8x32xf32>
    %c0_3 = arith.constant 0 : index
    %c0_4 = arith.constant 0 : index
    %4 = vector.load %arg3[%c0_3, %c0_4] : memref<1x32xf32, #tpu.memory_space<vmem>>, vector<1x32xf32>
    %5 = vector.broadcast %4 : vector<1x32xf32> to vector<8x32xf32>
    %6 = arith.addf %3, %5 : vector<8x32xf32>
    %cst_5 = arith.constant 0.000000e+00 : f32
    %7 = vector.broadcast %cst_5 : f32 to vector<8x32xf32>
    %8 = arith.maximumf %6, %7 : vector<8x32xf32>
    %9 = arith.truncf %8 : vector<8x32xf32> to vector<8x32xbf16>
    %c0_6 = arith.constant 0 : index
    %c0_7 = arith.constant 0 : index
    %10 = vector.load %arg4[%c0_6, %c0_7] : memref<32x4xbf16, #tpu.memory_space<vmem>>, vector<32x4xbf16>
    %cst_8 = arith.constant dense<0.000000e+00> : vector<8x4xf32>
    %11 = tpu.matmul %9, %10, %cst_8 {dimension_numbers = #tpu.dot_dimension_numbers<[1], [0], [0], [1], [0, 0, 1, 1], [], []>} : vector<8x32xbf16>, vector<32x4xbf16>, vector<8x4xf32> -> vector<8x4xf32>
    %c0_9 = arith.constant 0 : index
    %c0_10 = arith.constant 0 : index
    %12 = vector.load %arg5[%c0_9, %c0_10] : memref<1x4xf32, #tpu.memory_space<vmem>>, vector<1x4xf32>
    %13 = vector.broadcast %12 : vector<1x4xf32> to vector<8x4xf32>
    %14 = arith.addf %11, %13 : vector<8x4xf32>
    %c0_11 = arith.constant 0 : index
    %c0_12 = arith.constant 0 : index
    %15 = vector.load %arg6[%c0_11, %c0_12] : memref<8x4xf32, #tpu.memory_space<vmem>>, vector<8x4xf32>
    tpu.vector_store %arg6[%c0_11, %c0_12], %14 {strides = array<i32>} : memref<8x4xf32, #tpu.memory_space<vmem>>, vector<8x4xf32>,
    return
  }
  func.func @transform_0(%arg0: i32) -> (i32, i32) {
    %c0_i32 = arith.constant 0 : i32
    %c0_i32_0 = arith.constant 0 : i32
    return %arg0, %c0_i32 : i32, i32
  }
  func.func @transform_1(%arg0: i32) -> (i32, i32) {
    %c0_i32 = arith.constant 0 : i32
    %c0_i32_0 = arith.constant 0 : i32
    %c0_i32_1 = arith.constant 0 : i32
    return %c0_i32, %c0_i32_0 : i32, i32
  }
  func.func @transform_2(%arg0: i32) -> (i32, i32) {
    %c0_i32 = arith.constant 0 : i32
    %c0_i32_0 = arith.constant 0 : i32
    %c0_i32_1 = arith.constant 0 : i32
    return %c0_i32, %c0_i32_0 : i32, i32
  }
  func.func @transform_3(%arg0: i32) -> (i32, i32) {
    %c0_i32 = arith.constant 0 : i32
    %c0_i32_0 = arith.constant 0 : i32
    %c0_i32_1 = arith.constant 0 : i32
    return %c0_i32, %c0_i32_0 : i32, i32
  }
  func.func @transform_4(%arg0: i32) -> (i32, i32) {
    %c0_i32 = arith.constant 0 : i32
    %c0_i32_0 = arith.constant 0 : i32
    %c0_i32_1 = arith.constant 0 : i32
    return %c0_i32, %c0_i32_0 : i32, i32
  }
  func.func @transform_5(%arg0: i32) -> (i32, i32) {
    %c0_i32 = arith.constant 0 : i32
    %c0_i32_0 = arith.constant 0 : i32
    return %arg0, %c0_i32 : i32, i32
  }
}

</mosaic_0001>

<bundles_post_ra>
// kernel: net_forward.1
= control target key start
LH: loop header
LB: loop body
LE: loop exit
PB: predicated region body
PF: predicated region fallthrough
CT: control target
= control target key end

     0   :  { %vm32_vm0 = vcmask 1041408   ;;  %vm28_vm1 = vcmask 31744   ;;  %vm71_vm2 = vcmask 261120   ;;  %s160_s1 = inlined_call_operand.vmem [shape: bf16[4,32], index: 1, kind: input, shape index: {}]   ;;  %s161_s0 = inlined_call_operand.vmem [shape: f32[8,4], index: 0, kind: input, shape index: {}]   ;;  %s162_s2 = inlined_call_operand.vmem [shape: f32[1,32], index: 2, kind: input, shape index: {}]   ;;  %s163_s4 = inlined_call_operand.vmem [shape: f32[1,4], index: 4, kind: input, shape index: {}]   ;;  %s164_s3 = inlined_call_operand.vmem [shape: bf16[32,4], index: 3, kind: input, shape index: {}]   ;;  %s165_s5 = inlined_call_operand.vmem [shape: f32[8,4], index: 5, kind: output, shape index: {}]  }
   0x1   :  { %v23_v0 = vld [vmem:[%s160_s1] sm:$0x3]  ;;  %v104_v4 = vld [vmem:[%s164_s3 + $0x8] sm:$0xff] }
   0x2   :  { %v21_v1 = vld [vmem:[%s161_s0] sm:$0xff]  ;;  %v34_v2 = vsel %vm32_vm0, %v23_v0, 0  ;;  %81 = vmatpush.bf16.msra.mxu1 %v104_v4 }
   0x3   :  { %v22_v3 = vpack.c.bf16 %v21_v1, %v21_v1  ;;  %43 = vmatpush.bf16.msra.mxu0 %v34_v2  ;;  %v103_v5 = vld [vmem:[%s164_s3] sm:$0xff] }
   0x4   :  { %v105_v6 = vld [vmem:[%s162_s2] ss:$0 sm:$0xff] }
   0x5   :  { %v106_v12 = vld [vmem:[%s163_s4] ss:$0 sm:$0xff] }
   0x6   :  { %93 = vmatmul.msk.bf16.vlgmr.msra.gmra.mxu0 %vm28_vm1, %v22_v3  ;;  %82 = vmatpush.bf16.msra.mxu1 %v103_v5 }
  0x83   :  { %v45_v7 = vpop.f32.mrf.mxu0 }
  0x84   :  { %v46_v8 = vadd.f32 %v105_v6, %v45_v7 }
  0x86   :  { %v49_v9 = vmax.f32 %v46_v8, 0.0 }
  0x88   :  { %v50_v10 = vpack.c.bf16 %v49_v9, %v49_v9 }
  0x8a   :  { %102 = vmatmul.msk.bf16.vlgmr.msra.gmra.mxu1 %vm71_vm2, %v50_v10 }
  0x8b   :  { %v47_v11 = vpop.f32.mrf.mxu0 }
 0x107   :  { %v84_v13 = vpop.f32.mrf.mxu1 }
 0x108   :  { %v85_v14 = vadd.f32 %v106_v12, %v84_v13 }
 0x10a   :  { %88 = vst.msk [vmem:[%s165_s5] sm:$0xff] %vm28_vm1, %v85_v14 }
 0x10f   :  { %v86_v15 = vpop.f32.mrf.mxu1 }

// kernel: net_forward.1
= control target key start
LH: loop header
LB: loop body
LE: loop exit
PB: predicated region body
PF: predicated region fallthrough
CT: control target
= control target key end

     0   :  { %vm32_vm0 = vcmask 1041408   ;;  %vm28_vm1 = vcmask 31744   ;;  %vm71_vm2 = vcmask 261120   ;;  %s160_s1 = inlined_call_operand.vmem [shape: bf16[4,32], index: 1, kind: input, shape index: {}]   ;;  %s161_s0 = inlined_call_operand.vmem [shape: f32[8,4], index: 0, kind: input, shape index: {}]   ;;  %s162_s2 = inlined_call_operand.vmem [shape: f32[1,32], index: 2, kind: input, shape index: {}]   ;;  %s163_s4 = inlined_call_operand.vmem [shape: f32[1,4], index: 4, kind: input, shape index: {}]   ;;  %s164_s3 = inlined_call_operand.vmem [shape: bf16[32,4], index: 3, kind: input, shape index: {}]   ;;  %s165_s5 = inlined_call_operand.vmem [shape: f32[8,4], index: 5, kind: output, shape index: {}]  }
   0x1   :  { %v23_v0 = vld [vmem:[%s160_s1] sm:$0x3]  ;;  %v104_v4 = vld [vmem:[%s164_s3 + $0x8] sm:$0xff] }
   0x2   :  { %v21_v1 = vld [vmem:[%s161_s0] sm:$0xff]  ;;  %v34_v2 = vsel %vm32_vm0, %v23_v0, 0  ;;  %81 = vmatpush.bf16.msra.mxu1 %v104_v4 }
   0x3   :  { %v22_v3 = vpack.c.bf16 %v21_v1, %v21_v1  ;;  %43 = vmatpush.bf16.msra.mxu0 %v34_v2  ;;  %v103_v5 = vld [vmem:[%s164_s3] sm:$0xff] }
   0x4   :  { %v105_v6 = vld [vmem:[%s162_s2] ss:$0 sm:$0xff] }
   0x5   :  { %v106_v12 = vld [vmem:[%s163_s4] ss:$0 sm:$0xff] }
   0x6   :  { %93 = vmatmul.msk.bf16.vlgmr.msra.gmra.mxu0 %vm28_vm1, %v22_v3  ;;  %82 = vmatpush.bf16.msra.mxu1 %v103_v5 }
  0x83   :  { %v45_v7 = vpop.f32.mrf.mxu0 }
  0x84   :  { %v46_v8 = vadd.f32 %v105_v6, %v45_v7 }
  0x86   :  { %v49_v9 = vmax.f32 %v46_v8, 0.0 }
  0x88   :  { %v50_v10 = vpack.c.bf16 %v49_v9, %v49_v9 }
  0x8a   :  { %102 = vmatmul.msk.bf16.vlgmr.msra.gmra.mxu1 %vm71_vm2, %v50_v10 }
  0x8b   :  { %v47_v11 = vpop.f32.mrf.mxu0 }
 0x107   :  { %v84_v13 = vpop.f32.mrf.mxu1 }
 0x108   :  { %v85_v14 = vadd.f32 %v106_v12, %v84_v13 }
 0x10a   :  { %88 = vst.msk [vmem:[%s165_s5] sm:$0xff] %vm28_vm1, %v85_v14 }
 0x10f   :  { %v86_v15 = vpop.f32.mrf.mxu1 }

</bundles_post_ra>
